<compile_context>
chip_gen: v6e
topology: v6e:2x2x1
jax: 0.10.0
libtpu: 0.0.40
codegen_flags: <defaults>
</compile_context>

<pallas_src>
from functools import partial

import jax
import jax.numpy as jnp
import numpy as np
from jax.experimental import pallas as pl
from jax.experimental.pallas import tpu as pltpu


def _patch_embed_kernel(p_ref, w_ref, b_ref, o_ref):
    # p_ref: (Mt, K) patch rows; w_ref: (K, D) projection; b_ref: (1, D) f32 bias;
    # o_ref: (Mt, D).  Single MXU matmul with f32 accumulation, bias add on VPU.
    acc = jnp.dot(p_ref[...], w_ref[...], preferred_element_type=jnp.float32)
    o_ref[...] = (acc + b_ref[...]).astype(o_ref.dtype)


def _round_up(x, m):
    return ((x + m - 1) // m) * m


def _pick_m_tile(M, K, D, in_bytes, out_bytes):
    """Choose the M tile and VMEM limit so the kernel fits every TPU generation.

    Working set: double-buffered (Mt,K) input tile and (Mt,D) output tile plus the
    grid-invariant (K,D) weight and (1,D) bias (pipeline still allocates 2 bufs).
    Budget 24 MiB keeps it under v7x's 32 MiB default scoped limit (64 MiB phys).
    """
    budget = 24 * 1024 * 1024

    def est(mt):
        return (2 * mt * K * in_bytes          # double-buffered patch tiles
                + 2 * K * D * in_bytes         # resident weight (2 pipeline bufs)
                + 2 * D * 4                    # bias
                + 2 * mt * D * out_bytes)      # double-buffered output tiles

    cap = 1024
    while cap > 64 and est(cap) > budget:
        cap //= 2

    if M <= 512:
        Mt = M  # single step; a full-M block is always layout-legal
    else:
        # >= 2 grid steps so the "parallel" M axis feeds both TensorCores on
        # dual-TC chips (v7x), while keeping tiles as large as the budget allows.
        Mt = min(cap, max(256, _round_up(-(-M // 2), 8)))

    vmem_limit = int(min(64 * 1024 * 1024,
                         max(32 * 1024 * 1024, (est(max(Mt, 8)) * 3) // 2)))
    return Mt, vmem_limit


def patch_embed_pallas(x, w_conv, b_conv=None, *, patch_size, compute_in_bf16=True):
    """PatchEmbed forward.

    x:       (B, C, H, W)
    w_conv:  (embed_dim, C, P, P)   -- PyTorch Conv2d weight layout
    b_conv:  (embed_dim,) or None
    returns: (B, num_patches, embed_dim)   (same dtype as x)
    """
    B, C, H, W = x.shape
    P = patch_size
    assert H % P == 0 and W % P == 0, "image size must be divisible by patch size"
    GH, GW = H // P, W // P
    num_patches = GH * GW
    D = w_conv.shape[0]
    K = C * P * P
    out_dtype = x.dtype

    # bf16 operands (f32 accumulation kept): serves both v5e's MXU-bound regime
    # and v6e/v7x's HBM-bound regime.  Output dtype is preserved.
    if compute_in_bf16 and x.dtype == jnp.float32:
        x = x.astype(jnp.bfloat16)
    w = w_conv
    if compute_in_bf16 and w.dtype == jnp.float32:
        w = w.astype(jnp.bfloat16)
    if w.dtype != x.dtype:
        w = w.astype(x.dtype)

    # Patchify: (B, C, H, W) -> (B*num_patches, C*P*P); minor order (c, ph, pw)
    # matches the Conv2d weight flattening below.  With allow_input_fusion=[0]
    # XLA fuses this chain into the pallas_call input DMA (no HBM round trip).
    patches = (
        x.reshape(B, C, GH, P, GW, P)
         .transpose(0, 2, 4, 1, 3, 5)
         .reshape(B * num_patches, K)
    )
    # Conv2d weight (D, C, P, P) -> (K, D) so the kernel computes p @ W + b.
    w_mat = w.reshape(D, K).T
    if b_conv is None:
        b_mat = jnp.zeros((1, D), jnp.float32)
    else:
        b_mat = b_conv.reshape(1, D).astype(jnp.float32)

    M = B * num_patches
    Mt, vmem_limit = _pick_m_tile(M, K, D,
                                  patches.dtype.itemsize,
                                  jnp.dtype(out_dtype).itemsize)
    grid = (pl.cdiv(M, Mt),)  # no jnp.pad: Pallas masks the ragged tail block

    out = pl.pallas_call(
        _patch_embed_kernel,
        out_shape=jax.ShapeDtypeStruct((M, D), out_dtype),
        grid_spec=pltpu.PrefetchScalarGridSpec(
            num_scalar_prefetch=0,
            grid=grid,
            in_specs=[
                pl.BlockSpec((Mt, K), lambda i: (i, 0)),   # patch rows (tiled over M)
                pl.BlockSpec((K, D), lambda i: (0, 0)),    # projection weight (resident)
                pl.BlockSpec((1, D), lambda i: (0, 0)),    # bias (resident, f32)
            ],
            out_specs=pl.BlockSpec((Mt, D), lambda i: (i, 0)),
        ),
        compiler_params=pltpu.CompilerParams(
            dimension_semantics=("parallel",),
            vmem_limit_bytes=vmem_limit,
            allow_input_fusion=[0],
        ),
    )(patches, w_mat, b_mat)

    # norm = nn.Identity() -> no-op.
    return out.reshape(B, num_patches, D)


def patch_embed_reference(x, w_conv, b_conv, *, patch_size):
    # Pure-JAX reference mirroring the PyTorch forward exactly:
    # Conv2d(stride=kernel=P) -> flatten(2) -> transpose(1, 2); norm = Identity.
    P = patch_size
    y = jax.lax.conv_general_dilated(
        x, w_conv, window_strides=(P, P), padding="VALID",
        dimension_numbers=("NCHW", "OIHW", "NCHW"))
    y = y + b_conv.reshape(1, -1, 1, 1)
    B, D, GH, GW = y.shape
    return y.reshape(B, D, GH * GW).transpose(0, 2, 1)


if __name__ == "__main__":
    # Small shapes consistent with the module: 16x16 image, 4x4 patches,
    # 3 input channels, embed_dim=32 -> output (B, num_patches, D) = (2, 16, 32).
    B, C, H, W = 2, 3, 16, 16
    P = 4
    D = 32

    key = jax.random.PRNGKey(0)
    kx, kw, kb = jax.random.split(key, 3)

    x = jax.random.normal(kx, (B, C, H, W), dtype=jnp.float32)
    fan_in = C * P * P
    w_conv = jax.random.normal(kw, (D, C, P, P), dtype=jnp.float32) / np.sqrt(fan_in)
    b_conv = jax.random.normal(kb, (D,), dtype=jnp.float32) * 0.01

    ref = patch_embed_reference(x, w_conv, b_conv, patch_size=P)

    # Exact-path check (f32 operands): tight tolerance.
    fwd_f32 = jax.jit(partial(patch_embed_pallas, patch_size=P, compute_in_bf16=False))
    out_f32 = jax.block_until_ready(fwd_f32(x, w_conv, b_conv))
    np.testing.assert_allclose(np.asarray(out_f32), np.asarray(ref),
                               rtol=1e-4, atol=1e-4)

    # Fast path (bf16 operands, f32 accumulation): bf16-level tolerance.
    fwd_bf16 = jax.jit(partial(patch_embed_pallas, patch_size=P, compute_in_bf16=True))
    out_bf16 = jax.block_until_ready(fwd_bf16(x, w_conv, b_conv))
    np.testing.assert_allclose(np.asarray(out_bf16), np.asarray(ref),
                               rtol=3e-2, atol=3e-2)

    print("KERNEL_OK")
</pallas_src>

<mosaic_0001>
module attributes {stable_mosaic.version = 11 : i64} {
  func.func @_patch_embed_kernel(%arg0: i32, %arg1: memref<32x48xf32, #tpu.memory_space<vmem>>, %arg2: memref<48x32xf32, #tpu.memory_space<vmem>>, %arg3: memref<1x32xf32, #tpu.memory_space<vmem>>, %arg4: memref<32x32xf32, #tpu.memory_space<vmem>>) attributes {dimension_semantics = [#tpu.dimension_semantics<parallel>], iteration_bounds = array<i64: 1>, scalar_prefetch = 0 : i64, scratch_operands = 0 : i64, tpu.core_type = #tpu.core_type<tc>, window_params = [{transform_indices = @transform_0, window_bounds = array<i64: 32, 48>}, {pipeline_mode = #tpu.pipeline_mode<synchronous>, transform_indices = @transform_1, window_bounds = array<i64: 48, 32>}, {pipeline_mode = #tpu.pipeline_mode<synchronous>, transform_indices = @transform_2, window_bounds = array<i64: 1, 32>}, {transform_indices = @transform_3, window_bounds = array<i64: 32, 32>}]} {
    %c0 = arith.constant 0 : index
    %c0_0 = arith.constant 0 : index
    %0 = vector.load %arg1[%c0, %c0_0] : memref<32x48xf32, #tpu.memory_space<vmem>>, vector<32x48xf32>
    %c0_1 = arith.constant 0 : index
    %c0_2 = arith.constant 0 : index
    %1 = vector.load %arg2[%c0_1, %c0_2] : memref<48x32xf32, #tpu.memory_space<vmem>>, vector<48x32xf32>
    %cst = arith.constant dense<0.000000e+00> : vector<32x32xf32>
    %2 = tpu.matmul %0, %1, %cst {dimension_numbers = #tpu.dot_dimension_numbers<[1], [0], [0], [1], [0, 0, 1, 1], [], []>} : vector<32x48xf32>, vector<48x32xf32>, vector<32x32xf32> -> vector<32x32xf32>
    %c0_3 = arith.constant 0 : index
    %c0_4 = arith.constant 0 : index
    %3 = vector.load %arg3[%c0_3, %c0_4] : memref<1x32xf32, #tpu.memory_space<vmem>>, vector<1x32xf32>
    %4 = vector.broadcast %3 : vector<1x32xf32> to vector<32x32xf32>
    %5 = arith.addf %2, %4 : vector<32x32xf32>
    %c0_5 = arith.constant 0 : index
    %c0_6 = arith.constant 0 : index
    %6 = vector.load %arg4[%c0_5, %c0_6] : memref<32x32xf32, #tpu.memory_space<vmem>>, vector<32x32xf32>
    tpu.vector_store %arg4[%c0_5, %c0_6], %5 {strides = array<i32>} : memref<32x32xf32, #tpu.memory_space<vmem>>, vector<32x32xf32>,
    return
  }
  func.func @transform_0(%arg0: i32) -> (i32, i32) {
    %c0_i32 = arith.constant 0 : i32
    %c0_i32_0 = arith.constant 0 : i32
    return %arg0, %c0_i32 : i32, i32
  }
  func.func @transform_1(%arg0: i32) -> (i32, i32) {
    %c0_i32 = arith.constant 0 : i32
    %c0_i32_0 = arith.constant 0 : i32
    %c0_i32_1 = arith.constant 0 : i32
    return %c0_i32, %c0_i32_0 : i32, i32
  }
  func.func @transform_2(%arg0: i32) -> (i32, i32) {
    %c0_i32 = arith.constant 0 : i32
    %c0_i32_0 = arith.constant 0 : i32
    %c0_i32_1 = arith.constant 0 : i32
    return %c0_i32, %c0_i32_0 : i32, i32
  }
  func.func @transform_3(%arg0: i32) -> (i32, i32) {
    %c0_i32 = arith.constant 0 : i32
    %c0_i32_0 = arith.constant 0 : i32
    return %arg0, %c0_i32 : i32, i32
  }
}

</mosaic_0001>

<bundles_post_ra>
// kernel: patch_embed_pallas.1
= control target key start
LH: loop header
LB: loop body
LE: loop exit
PB: predicated region body
PF: predicated region fallthrough
CT: control target
= control target key end

     0   :  { %s280_s0 = inlined_call_operand.vmem [shape: f32[32,48], index: 0, kind: input, shape index: {}]   ;;  %s281_s1 = inlined_call_operand.vmem [shape: f32[48,32], index: 1, kind: input, shape index: {}]   ;;  %s282_s2 = inlined_call_operand.vmem [shape: f32[1,32], index: 2, kind: input, shape index: {}]   ;;  %s283_s3 = inlined_call_operand.hbm [shape: f32[32,32], index: 3, kind: output, shape index: {}]  }
   0x1   :  { %v24_v0 = vld [vmem:[%s281_s1 + $0x28] sm:$0xff]  ;;  %v23_v1 = vld [vmem:[%s281_s1 + $0x20] sm:$0xff]  ;;  %v22_v2 = vld [vmem:[%s281_s1 + $0x18] sm:$0xff] }
   0x2   :  { %166 = vmatprep.subr.mxu0 %v24_v0  ;;  %184 = vmatprep.subr.mxu1 %v24_v0 }
   0x3   :  { %167 = vmatpush3.msra.mxu0 %v24_v0  ;;  %190 = vmatpush3.msra.mxu1 %v24_v0 }
   0x4   :  { %168 = vmatprep.subr.mxu0 %v23_v1  ;;  %185 = vmatprep.subr.mxu1 %v23_v1 }
   0x5   :  { %8 = vsyncpa [#allocation3], 0  ;;  %169 = vmatpush3.msra.mxu0 %v23_v1  ;;  %191 = vmatpush3.msra.mxu1 %v23_v1  ;;  %v21_v3 = vld [vmem:[%s281_s1 + $0x10] sm:$0xff]  ;;  %v20_v4 = vld [vmem:[%s281_s1 + $0x8] sm:$0xff]  ;;  %vm32_vm0 = vcmask 392192   ;;  %s221_s6 = smov [#allocation2]  }
   0x6   :  { %170 = vmatprep.subr.mxu0 %v22_v2  ;;  %186 = vmatprep.subr.mxu1 %v22_v2  ;;  %v19_v5 = vld [vmem:[%s281_s1] sm:$0xff]  ;;  %v17_v7 = vld [vmem:[%s280_s0 + $0x10] sm:$0xff]  ;;  %v16_v8 = vld [vmem:[%s280_s0 + $0x8] sm:$0xff]  ;;  %s140_s7 = sshll.u32 %s221_s6, 4  ;;  %vm130_vm1 = vcmask 261120   ;;  %s141_s7 = int_to_ptr.vmem [resolvable:$true] %s140_s7 }
   0x7   :  { %171 = vmatpush3.msra.mxu0 %v22_v2  ;;  %192 = vmatpush3.msra.mxu1 %v22_v2  ;;  %v15_v6 = vld [vmem:[%s280_s0] sm:$0xff]  ;;  %v18_v9 = vld [vmem:[%s280_s0 + $0x18] sm:$0xff]  ;;  %s199_s0 = scalar_lea.vmem %s141_s7, 512  ;;  %p204_p1 = scmp.lt.s32.totalorder %s141_s7, %s141_s7 }
   0x8   :  { %172 = vmatprep.subr.mxu0 %v21_v3  ;;  %187 = vmatprep.subr.mxu1 %v21_v3  ;;  %v151_v10 = vld [vmem:[%s282_s2] ss:$0 sm:$0xff]  ;;  %p200_p0 = scmp.ne.s32.totalorder %s141_s7, %s199_s0  ;;  %p205_p2 = scmp.lt.s32.totalorder %s199_s0, %s199_s0 }
   0x9   :  { %173 = vmatpush3.msra.mxu0 %v21_v3  ;;  %193 = vmatpush3.msra.mxu1 %v21_v3 }
   0xa   :  { %174 = vmatprep.subr.mxu0 %v20_v4  ;;  %188 = vmatprep.subr.mxu1 %v20_v4  ;;  %p206_p3 = por %p205_p2, %p204_p1 }
   0xb   :  { %175 = vmatpush3.msra.mxu0 %v20_v4  ;;  %194 = vmatpush3.msra.mxu1 %v20_v4 }
   0xc   :  { %176 = vmatprep.subr.mxu0 %v19_v5  ;;  %189 = vmatprep.subr.mxu1 %v19_v5  ;;  %p207_p4 = pnand %p206_p3, %p200_p0 }
   0xd   :  { %177 = vmatpush3.msra.mxu0 %v19_v5  ;;  %195 = vmatpush3.msra.mxu1 %v19_v5 }
   0xe   :  { %178 = vmatprep.mubr.msk.f32.mxu0 %vm32_vm0, %v15_v6  ;;  %181 = vmatprep.mubr.msk.f32.mxu1 %vm32_vm0, %v17_v7 }
   0xf   :  { %179 = vmatmul.mubr.msk.f32.vlgmr.msra.gmra.mxu0 %vm32_vm0, %v16_v8  ;;  %182 = vmatmul.mubr.msk.f32.vlgmr.msra.gmra.mxu1 %vm32_vm0, %v18_v9 }
  0xcf   :  { %v180_v11 = vpop.f32.mrf.mxu0  ;;  %v183_v12 = vpop.f32.mrf.mxu1 }
  0xd0   :  { %v117_v13 = vadd.f32 %v180_v11, %v151_v10  ;;  %v127_v14 = vadd.f32 %v183_v12, %v151_v10 }
  0xd1   :  { %v111_v15 = vpop.f32.mrf.mxu0  ;;  %v121_v16 = vpop.f32.mrf.mxu1 }
  0xd2   :  { %132 = vst.msk [vmem:[#allocation2 + $0x8] sm:$0xff] %vm130_vm1, %v117_v13  ;;  %134 = vst.msk [vmem:[#allocation2 + $0x18] sm:$0xff] %vm130_vm1, %v127_v14  ;;  %v112_v17 = vadd.f32 %v151_v10, %v111_v15  ;;  %v122_v18 = vadd.f32 %v151_v10, %v121_v16 }
  0xd4   :  { %131 = vst.msk [vmem:[#allocation2] sm:$0xff] %vm130_vm1, %v112_v17  ;;  %133 = vst.msk [vmem:[#allocation2 + $0x10] sm:$0xff] %vm130_vm1, %v122_v18 }
  0xd5   :  { %210 = shalt.err (!%p207_p4)
}
  0xd6   :  { %s222_s2 = smov 128   ;;  %s223_s8 = smov 8  }
  0xd7   :  { %146 = dma.vmem_to_hbm [thread:$0]  %s141_s7, 512, %s283_s3, [#allocation3], %s222_s2, %s222_s2, %s223_s8  }
  0xd8   :  { %219 = dma.done.wait [#allocation3], 512  }
  0xd9   :  { %220 = vsyncadd [#allocation3], 4294966784 }
  0xda   :  { %150 = vsyncpa [#allocation3], 1 }

</bundles_post_ra>
